<compile_context>
chip_gen: v6e
topology: v6e:2x2x1
jax: 0.10.0
libtpu: 0.0.40
codegen_flags: <defaults>
</compile_context>

<pallas_src>
import functools
import math

import jax
import jax.numpy as jnp
from jax.experimental import pallas as pl
from jax.experimental.pallas import tpu as pltpu

_MIB = 1024 * 1024


def _round_up(x, m):
    return (x + m - 1) // m * m


# ----------------------------------------------------------------------------
# Kernel
# ----------------------------------------------------------------------------
def _ffn_kernel(x_ref, w1_ref, b1_ref, w2_ref, b2_ref, o_ref, acc_ref):
    # x_ref : (tm, d_model_p)   row tile, resident across the k axis
    # w1_ref: (d_model_p, tk)   d_ff slice of W1
    # b1_ref: (1, tk)           d_ff slice of b1 (f32)
    # w2_ref: (tk, d_model_p)   d_ff slice of W2
    # b2_ref: (1, d_model_p)    b2 (f32)
    # o_ref : (tm, d_model_p)   resident across k, written on last step
    # acc_ref: (tm, d_model_p)  f32 VMEM accumulator
    k = pl.program_id(1)

    # First matmul on this d_ff slice; f32 accumulation on the MXU.
    h = jnp.dot(x_ref[...], w1_ref[...], preferred_element_type=jnp.float32)
    h = jnp.maximum(h + b1_ref[...], 0.0)  # bias + ReLU in f32
    # TODO(synk): dropout is identity here (inference / eval mode).

    contrib = jnp.dot(h.astype(w2_ref.dtype), w2_ref[...],
                      preferred_element_type=jnp.float32)

    @pl.when(k == 0)
    def _():  # write directly: no zero-init + read-modify-write on step 0
        acc_ref[...] = contrib

    @pl.when(k > 0)
    def _():
        acc_ref[...] += contrib

    @pl.when(k == pl.num_programs(1) - 1)
    def _():
        o_ref[...] = (acc_ref[...] + b2_ref[...]).astype(o_ref.dtype)


# ----------------------------------------------------------------------------
# Generation-aware configuration
# ----------------------------------------------------------------------------
@functools.lru_cache(maxsize=None)
def _tpu_config():
    """Returns (vmem_budget_bytes, tm_cap, vmem_limit_bytes, min_row_tiles)."""
    kind = ""
    try:
        kind = jax.devices()[0].device_kind.lower()
    except Exception:
        pass
    vmem_cap = None
    try:
        vmem_cap = int(pltpu.get_tpu_info().vmem_capacity_bytes)
    except Exception:
        pass

    big_vmem = vmem_cap is not None and vmem_cap >= 128 * _MIB
    if "v7" in kind:
        # v7x: 64 MiB VMEM per TensorCore, 2 TensorCores per chip.
        big_vmem = False
    elif vmem_cap is None and any(t in kind for t in ("v4", "v5", "v6", "trillium")):
        big_vmem = True

    if big_vmem:
        # v5e / v6e: 128 MiB VMEM, single TensorCore -> big row tiles.
        return (96 * _MIB, 512, 100 * _MIB, 1)
    # v7x (or unknown, conservative): modest budget, feed both TensorCores.
    return (40 * _MIB, 256, 48 * _MIB, 2)


def _choose_tiles(n_rows, d_model_p, d_ff_p, bytes_el,
                  budget_bytes, tm_cap, min_row_tiles):
    """Pick (tm, tk): tk divides d_ff_p exactly; everything fits the budget."""
    # tk candidates: multiples of 128 that exactly divide d_ff_p (no weight
    # padding / zero-slice streaming), largest first.
    cands = [t for t in range(128, min(d_ff_p, 2048) + 1, 128) if d_ff_p % t == 0]
    cands.sort(reverse=True)

    tm = min(tm_cap, _round_up(n_rows, 8))
    # Guarantee enough row tiles for megacore sharding (v7x) when possible.
    if min_row_tiles > 1 and n_rows > 8 and _round_up(n_rows, tm) // tm < min_row_tiles:
        tm = max(8, _round_up(-(-n_rows // min_row_tiles), 8))

    def vmem_bytes(tm_, tk_):
        acc = tm_ * d_model_p * 4                       # f32 accumulator
        io = 2 * 2 * tm_ * d_model_p * bytes_el         # x + out, double-buffered
        w = 2 * 2 * d_model_p * tk_ * bytes_el          # W1 + W2 slices, dbl-buffered
        b = 2 * 2 * (tk_ + d_model_p) * 4               # biases, double-buffered
        return acc + io + w + b

    def pick_tk(tm_, floor):
        for t in cands:
            if t >= floor and vmem_bytes(tm_, t) <= budget_bytes:
                return t
        return None

    # Prefer tk >= 256 (full MXU depth); shrink tm only if needed.
    tk = pick_tk(tm, 256)
    tm_try = tm
    while tk is None and tm_try > 8:
        tm_try = max(8, _round_up(tm_try // 2, 8))
        tk = pick_tk(tm_try, 256)
    if tk is not None:
        return tm_try, tk

    # Last resort: allow tk = 128.
    tk = pick_tk(tm, 128)
    while tk is None and tm > 8:
        tm = max(8, _round_up(tm // 2, 8))
        tk = pick_tk(tm, 128)
    if tk is None:
        tm, tk = 8, 128
    return tm, tk


# ----------------------------------------------------------------------------
# Parameter preparation (one-time, outside the hot path)
# ----------------------------------------------------------------------------
def prepare_ffn_params(w1, b1, w2, b2, *, compute_dtype=None):
    """Pad weights to lane-aligned shapes and optionally cast for the MXU.

    Call once at init; `ffn_forward` then only pads / casts x per call.
    w1: (d_model, d_ff), w2: (d_ff, d_model) — i.e. transposed vs torch layout.
    """
    d_model, d_ff = w1.shape
    d_model_p = _round_up(d_model, 128)
    d_ff_p = _round_up(d_ff, 128)

    w1p = jnp.pad(w1, ((0, d_model_p - d_model), (0, d_ff_p - d_ff)))
    b1p = jnp.pad(b1, (0, d_ff_p - d_ff)).reshape(1, d_ff_p).astype(jnp.float32)
    w2p = jnp.pad(w2, ((0, d_ff_p - d_ff), (0, d_model_p - d_model)))
    b2p = jnp.pad(b2, (0, d_model_p - d_model)).reshape(1, d_model_p).astype(jnp.float32)

    if compute_dtype is not None:
        cdt = jnp.dtype(compute_dtype)
        w1p = w1p.astype(cdt)
        w2p = w2p.astype(cdt)
    return w1p, b1p, w2p, b2p


# ----------------------------------------------------------------------------
# Forward
# ----------------------------------------------------------------------------
@jax.jit
def ffn_forward(x, w1p, b1p, w2p, b2p):
    """x: (..., d_model). Weights must come from prepare_ffn_params."""
    *lead, d_model = x.shape
    out_dtype = x.dtype
    d_model_p, d_ff_p = w1p.shape
    assert d_model_p % 128 == 0 and d_ff_p % 128 == 0
    assert d_model_p >= d_model
    assert w2p.shape == (d_ff_p, d_model_p)
    assert b1p.shape == (1, d_ff_p) and b2p.shape == (1, d_model_p)

    cdt = w1p.dtype                       # matmul-input dtype (e.g. bf16)
    n_rows = math.prod(lead) if lead else 1

    budget, tm_cap, vmem_limit, min_row_tiles = _tpu_config()
    tm, tk = _choose_tiles(n_rows, d_model_p, d_ff_p, jnp.dtype(cdt).itemsize,
                           budget, tm_cap, min_row_tiles)
    n_rows_p = _round_up(n_rows, tm)

    # Hot-path padding is limited to the (small) activation tensor.
    x2d = x.reshape(n_rows, d_model)
    if x2d.dtype != cdt:
        x2d = x2d.astype(cdt)
    x2d = jnp.pad(x2d, ((0, n_rows_p - n_rows), (0, d_model_p - d_model)))

    grid = (n_rows_p // tm, d_ff_p // tk)
    n_row_tiles = grid[0]

    flops = 2 * 2 * n_rows_p * d_model_p * d_ff_p       # two matmuls
    bytes_accessed = (
        x2d.size * x2d.dtype.itemsize
        + n_row_tiles * (w1p.size * w1p.dtype.itemsize
                         + w2p.size * w2p.dtype.itemsize)  # re-streamed per row tile
        + n_rows_p * d_model_p * jnp.dtype(out_dtype).itemsize)

    out_p = pl.pallas_call(
        _ffn_kernel,
        out_shape=jax.ShapeDtypeStruct((n_rows_p, d_model_p), out_dtype),
        grid_spec=pltpu.PrefetchScalarGridSpec(
            num_scalar_prefetch=0,
            grid=grid,
            in_specs=[
                pl.BlockSpec((tm, d_model_p), lambda i, k: (i, 0)),    # x rows
                pl.BlockSpec((d_model_p, tk), lambda i, k: (0, k)),    # W1 slice
                pl.BlockSpec((1, tk), lambda i, k: (0, k)),            # b1 slice
                pl.BlockSpec((tk, d_model_p), lambda i, k: (k, 0)),    # W2 slice
                pl.BlockSpec((1, d_model_p), lambda i, k: (0, 0)),     # b2
            ],
            out_specs=pl.BlockSpec((tm, d_model_p), lambda i, k: (i, 0)),
            scratch_shapes=[pltpu.VMEM((tm, d_model_p), jnp.float32)],
        ),
        compiler_params=pltpu.CompilerParams(
            dimension_semantics=("parallel", "arbitrary"),
            vmem_limit_bytes=vmem_limit,
        ),
        cost_estimate=pl.CostEstimate(
            flops=flops, transcendentals=0, bytes_accessed=bytes_accessed),
    )(x2d, w1p, b1p, w2p, b2p)

    return out_p[:n_rows, :d_model].reshape(*lead, d_model)


# ----------------------------------------------------------------------------
# Init + reference
# ----------------------------------------------------------------------------
def init_ffn_params(key, d_model, d_ff, dtype=jnp.float32):
    """Deterministic init mimicking nn.Linear's uniform(-1/sqrt(fan_in), ...)."""
    k1, k2, k3, k4 = jax.random.split(key, 4)
    bound1 = 1.0 / (d_model ** 0.5)
    bound2 = 1.0 / (d_ff ** 0.5)
    # Stored transposed relative to torch (out,in) so the kernel does x @ W.
    w1 = jax.random.uniform(k1, (d_model, d_ff), dtype, -bound1, bound1)
    b1 = jax.random.uniform(k2, (d_ff,), dtype, -bound1, bound1)
    w2 = jax.random.uniform(k3, (d_ff, d_model), dtype, -bound2, bound2)
    b2 = jax.random.uniform(k4, (d_model,), dtype, -bound2, bound2)
    return w1, b1, w2, b2


def _ref_ffn(x, w1, b1, w2, b2):
    hi = jax.lax.Precision.HIGHEST
    h = jnp.maximum(jnp.dot(x, w1, precision=hi) + b1, 0.0)
    return jnp.dot(h, w2, precision=hi) + b2


if __name__ == "__main__":
    key = jax.random.PRNGKey(0)
    kx, kp, kx2, kp2 = jax.random.split(key, 4)

    # --- Small demo shapes matching the module (eval-mode dropout). ---
    batch, seq, d_model, d_ff = 2, 8, 32, 64
    x = jax.random.normal(kx, (batch, seq, d_model), dtype=jnp.float32)
    w1, b1, w2, b2 = init_ffn_params(kp, d_model, d_ff)
    params = prepare_ffn_params(w1, b1, w2, b2)            # one-time prep

    out = jax.block_until_ready(ffn_forward(x, *params))
    ref = _ref_ffn(x, w1, b1, w2, b2)
    assert out.shape == (batch, seq, d_model)
    assert jnp.allclose(out, ref, atol=1e-5, rtol=1e-5)

    # --- Second config: multiple d_ff reduction steps + non-multiple-of-8
    #     row count (row padding path). ---
    b2_, s2_, dm2, dff2 = 2, 21, 128, 4096
    x2 = jax.random.normal(kx2, (b2_, s2_, dm2), dtype=jnp.float32)
    raw2 = init_ffn_params(kp2, dm2, dff2)
    params2 = prepare_ffn_params(*raw2)
    out2 = jax.block_until_ready(ffn_forward(x2, *params2))
    ref2 = _ref_ffn(x2, *raw2)
    assert out2.shape == (b2_, s2_, dm2)
    assert jnp.allclose(out2, ref2, atol=1e-4, rtol=1e-4)

    # --- bf16 matmul path (recommended on v5e/v6e/v7x); f32 accumulation.
    #     Checked for accuracy against the f32 reference, not just finiteness.
    params2_bf16 = prepare_ffn_params(*raw2, compute_dtype=jnp.bfloat16)
    out_bf16 = jax.block_until_ready(ffn_forward(x2, *params2_bf16))
    assert out_bf16.shape == (b2_, s2_, dm2)
    assert bool(jnp.all(jnp.isfinite(out_bf16)))
    assert jnp.allclose(out_bf16.astype(jnp.float32), ref2, atol=5e-2, rtol=5e-2)

    print("KERNEL_OK")
</pallas_src>

<mosaic_0001>
module attributes {stable_mosaic.version = 11 : i64} {
  func.func @_ffn_kernel(%arg0: i32, %arg1: i32, %arg2: memref<8x128xf32, #tpu.memory_space<vmem>>, %arg3: memref<128x128xf32, #tpu.memory_space<vmem>>, %arg4: memref<1x128xf32, #tpu.memory_space<vmem>>, %arg5: memref<128x128xf32, #tpu.memory_space<vmem>>, %arg6: memref<1x128xf32, #tpu.memory_space<vmem>>, %arg7: memref<8x128xf32, #tpu.memory_space<vmem>>, %arg8: memref<8x128xf32, #tpu.memory_space<vmem>>) attributes {dimension_semantics = [#tpu.dimension_semantics<parallel>, #tpu.dimension_semantics<arbitrary>], iteration_bounds = array<i64: 2, 1>, scalar_prefetch = 0 : i64, scratch_operands = 1 : i64, tpu.core_type = #tpu.core_type<tc>, window_params = [{transform_indices = @transform_0, window_bounds = array<i64: 8, 128>}, {transform_indices = @transform_1, window_bounds = array<i64: 128, 128>}, {transform_indices = @transform_2, window_bounds = array<i64: 1, 128>}, {transform_indices = @transform_3, window_bounds = array<i64: 128, 128>}, {pipeline_mode = #tpu.pipeline_mode<synchronous>, transform_indices = @transform_4, window_bounds = array<i64: 1, 128>}, {transform_indices = @transform_5, window_bounds = array<i64: 8, 128>}]} {
    %c0 = arith.constant 0 : index
    %c0_0 = arith.constant 0 : index
    %0 = vector.load %arg2[%c0, %c0_0] : memref<8x128xf32, #tpu.memory_space<vmem>>, vector<8x128xf32>
    %c0_1 = arith.constant 0 : index
    %c0_2 = arith.constant 0 : index
    %1 = vector.load %arg3[%c0_1, %c0_2] : memref<128x128xf32, #tpu.memory_space<vmem>>, vector<128x128xf32>
    %cst = arith.constant dense<0.000000e+00> : vector<8x128xf32>
    %2 = tpu.matmul %0, %1, %cst {dimension_numbers = #tpu.dot_dimension_numbers<[1], [0], [0], [1], [0, 0, 1, 1], [], []>} : vector<8x128xf32>, vector<128x128xf32>, vector<8x128xf32> -> vector<8x128xf32>
    %c0_3 = arith.constant 0 : index
    %c0_4 = arith.constant 0 : index
    %3 = vector.load %arg4[%c0_3, %c0_4] : memref<1x128xf32, #tpu.memory_space<vmem>>, vector<1x128xf32>
    %4 = vector.broadcast %3 : vector<1x128xf32> to vector<8x128xf32>
    %5 = arith.addf %2, %4 : vector<8x128xf32>
    %cst_5 = arith.constant 0.000000e+00 : f32
    %6 = vector.broadcast %cst_5 : f32 to vector<8x128xf32>
    %7 = arith.maximumf %5, %6 : vector<8x128xf32>
    %c0_6 = arith.constant 0 : index
    %c0_7 = arith.constant 0 : index
    %8 = vector.load %arg5[%c0_6, %c0_7] : memref<128x128xf32, #tpu.memory_space<vmem>>, vector<128x128xf32>
    %cst_8 = arith.constant dense<0.000000e+00> : vector<8x128xf32>
    %9 = tpu.matmul %7, %8, %cst_8 {dimension_numbers = #tpu.dot_dimension_numbers<[1], [0], [0], [1], [0, 0, 1, 1], [], []>} : vector<8x128xf32>, vector<128x128xf32>, vector<8x128xf32> -> vector<8x128xf32>
    %c0_i32 = arith.constant 0 : i32
    %10 = arith.cmpi eq, %arg1, %c0_i32 : i32
    %11 = arith.extui %10 : i1 to i32
    %c0_i32_9 = arith.constant 0 : i32
    %12 = arith.cmpi ne, %11, %c0_i32_9 : i32
    scf.if %12 {
      %c0_14 = arith.constant 0 : index
      %c0_15 = arith.constant 0 : index
      %19 = vector.load %arg8[%c0_14, %c0_15] : memref<8x128xf32, #tpu.memory_space<vmem>>, vector<8x128xf32>
      tpu.vector_store %arg8[%c0_14, %c0_15], %9 {strides = array<i32>} : memref<8x128xf32, #tpu.memory_space<vmem>>, vector<8x128xf32>,
    } else {
    }
    %c0_i32_10 = arith.constant 0 : i32
    %13 = arith.cmpi sgt, %arg1, %c0_i32_10 : i32
    %14 = arith.extui %13 : i1 to i32
    %c0_i32_11 = arith.constant 0 : i32
    %15 = arith.cmpi ne, %14, %c0_i32_11 : i32
    scf.if %15 {
      %c0_14 = arith.constant 0 : index
      %c0_15 = arith.constant 0 : index
      %19 = vector.load %arg8[%c0_14, %c0_15] : memref<8x128xf32, #tpu.memory_space<vmem>>, vector<8x128xf32>
      %20 = arith.addf %19, %9 : vector<8x128xf32>
      %c0_16 = arith.constant 0 : index
      %c0_17 = arith.constant 0 : index
      %21 = vector.load %arg8[%c0_16, %c0_17] : memref<8x128xf32, #tpu.memory_space<vmem>>, vector<8x128xf32>
      tpu.vector_store %arg8[%c0_16, %c0_17], %20 {strides = array<i32>} : memref<8x128xf32, #tpu.memory_space<vmem>>, vector<8x128xf32>,
    } else {
    }
    %c0_i32_12 = arith.constant 0 : i32
    %16 = arith.cmpi eq, %arg1, %c0_i32_12 : i32
    %17 = arith.extui %16 : i1 to i32
    %c0_i32_13 = arith.constant 0 : i32
    %18 = arith.cmpi ne, %17, %c0_i32_13 : i32
    scf.if %18 {
      %c0_14 = arith.constant 0 : index
      %c0_15 = arith.constant 0 : index
      %19 = vector.load %arg8[%c0_14, %c0_15] : memref<8x128xf32, #tpu.memory_space<vmem>>, vector<8x128xf32>
      %c0_16 = arith.constant 0 : index
      %c0_17 = arith.constant 0 : index
      %20 = vector.load %arg6[%c0_16, %c0_17] : memref<1x128xf32, #tpu.memory_space<vmem>>, vector<1x128xf32>
      %21 = vector.broadcast %20 : vector<1x128xf32> to vector<8x128xf32>
      %22 = arith.addf %19, %21 : vector<8x128xf32>
      %c0_18 = arith.constant 0 : index
      %c0_19 = arith.constant 0 : index
      %23 = vector.load %arg7[%c0_18, %c0_19] : memref<8x128xf32, #tpu.memory_space<vmem>>, vector<8x128xf32>
      tpu.vector_store %arg7[%c0_18, %c0_19], %22 {strides = array<i32>} : memref<8x128xf32, #tpu.memory_space<vmem>>, vector<8x128xf32>,
    } else {
    }
    return
  }
  func.func @transform_0(%arg0: i32, %arg1: i32) -> (i32, i32) {
    %c0_i32 = arith.constant 0 : i32
    %c0_i32_0 = arith.constant 0 : i32
    return %arg0, %c0_i32 : i32, i32
  }
  func.func @transform_1(%arg0: i32, %arg1: i32) -> (i32, i32) {
    %c0_i32 = arith.constant 0 : i32
    %c0_i32_0 = arith.constant 0 : i32
    return %c0_i32, %arg1 : i32, i32
  }
  func.func @transform_2(%arg0: i32, %arg1: i32) -> (i32, i32) {
    %c0_i32 = arith.constant 0 : i32
    %c0_i32_0 = arith.constant 0 : i32
    return %c0_i32, %arg1 : i32, i32
  }
  func.func @transform_3(%arg0: i32, %arg1: i32) -> (i32, i32) {
    %c0_i32 = arith.constant 0 : i32
    %c0_i32_0 = arith.constant 0 : i32
    return %arg1, %c0_i32 : i32, i32
  }
  func.func @transform_4(%arg0: i32, %arg1: i32) -> (i32, i32) {
    %c0_i32 = arith.constant 0 : i32
    %c0_i32_0 = arith.constant 0 : i32
    %c0_i32_1 = arith.constant 0 : i32
    return %c0_i32, %c0_i32_0 : i32, i32
  }
  func.func @transform_5(%arg0: i32, %arg1: i32) -> (i32, i32) {
    %c0_i32 = arith.constant 0 : i32
    %c0_i32_0 = arith.constant 0 : i32
    return %arg0, %c0_i32 : i32, i32
  }
}

</mosaic_0001>

<bundles_post_ra>
// kernel: ffn_forward.1
= control target key start
LH: loop header
LB: loop body
LE: loop exit
PB: predicated region body
PF: predicated region fallthrough
CT: control target
= control target key end

     0   :  { %10 = vsyncpa [#allocation4], 0  ;;  %s1016_s0 = inlined_call_operand.vmem [shape: f32[16,128], index: 0, kind: input, shape index: {}]   ;;  %s1017_s1 = inlined_call_operand.hbm [shape: f32[128,128], index: 1, kind: input, shape index: {}]   ;;  %s1018_s2 = inlined_call_operand.vmem [shape: f32[1,128], index: 2, kind: input, shape index: {}]   ;;  %s1019_s3 = inlined_call_operand.hbm [shape: f32[128,128], index: 3, kind: input, shape index: {}]   ;;  %s1020_s4 = inlined_call_operand.vmem [shape: f32[1,128], index: 4, kind: input, shape index: {}]   ;;  %s1021_s5 = inlined_call_operand.vmem [shape: f32[16,128], index: 5, kind: output, shape index: {}]  }
   0x1   :  { %11 = vsyncpa [#allocation6], 0  ;;  %s887_s18 = smov 0   ;;  %s889_s19 = smov 0  }
   0x2   :  { %s891_s20 = smov 0  }
   0x3 LB: > { %s598_s21 = sadd.s32 4294967295, %s849_s20   ;;  %s29_s22 = sadd.s32 1, %s845_s19  ;;  %s849_s20 = sphi %s891_s20, %s17_s20   ;;  %s845_s19 = sphi %s889_s19, %s1026_s19   ;;  %s841_s18 = sphi %s887_s18, %s1025_s18  }
   0x4   : > { %p31_p0 = scmp.ge.s32.totalorder %s29_s22, 2  ;;  %p600_p1 = scmp.ge.s32.totalorder %s849_s20, 1 }
   0x5   : > { %p185_p2 = scmp.lt.s32.totalorder %s849_s20, 3  ;;  %p912_p4 = scmp.eq.s32.totalorder %s598_s21, 0 }
   0x6   : > { %s1028_s22 = smov (%p31_p0, %s29_s22), 0  ;;  %s851_s25 = smov [#allocation3]  }
   0x7   : > { %p908_p3 = pnand %p600_p1, %p185_p2  ;;  %s199_s26 = sshll.u32 %s851_s25, 4  ;;  %s200_s26 = int_to_ptr.vmem [resolvable:$true] %s199_s26 }
   0x8   : > { %s852_s28 = smov [#allocation5]   ;;  %s778_s30 = scalar_lea.vmem %s200_s26, 2048 }
   0x9   : > { %p726_p5 = pneg %p908_p3  ;;  %s221_s29 = sshll.u32 %s852_s28, 4  ;;  %s222_s29 = int_to_ptr.vmem [resolvable:$true] %s221_s29 }
   0xa   : > { %p779_p8 = scmp.ne.s32.totalorder %s200_s26, %s778_s30  ;;  %p786_p11 = scmp.lt.s32.totalorder %s200_s26, %s200_s26 }
   0xb   : > { %p920_p6 = pnand %p912_p4, %p726_p5  ;;  %p787_p12 = scmp.lt.s32.totalorder %s778_s30, %s778_s30 }
   0xd   : > { %p769_p7 = pneg %p920_p6  ;;  %p788_p13 = por %p787_p12, %p786_p11 }
   0xf   : > { %p781_p9 = pnand %p779_p8, %p769_p7 }
  0x11   : > { %p782_p10 = pneg %p781_p9 }
  0x13   : > { %p789_p0 = pnand %p788_p13, %p782_p10 }
  0x15   : > { %792 = shalt.err (!%p789_p0)
}
  0x16   : > { %s853_s6 = smov 128   ;;  %s854_s7 = smov 8  }
  0x17   : > { %729 = dma.hbm_to_vmem [thread:$0]  (!%p920_p6), %s1017_s1, 2048, %s200_s26, [#allocation4], %s853_s6, %s853_s6, %s854_s7  }
  0x18   : > { %s804_s10 = scalar_lea.vmem %s222_s29, 2048  ;;  %p812_p8 = scmp.lt.s32.totalorder %s222_s29, %s222_s29 }
  0x19   : > { %p805_p1 = scmp.ne.s32.totalorder %s222_s29, %s804_s10  ;;  %p813_p9 = scmp.lt.s32.totalorder %s804_s10, %s804_s10 }
  0x1b   : > { %p807_p2 = pnand %p805_p1, %p769_p7  ;;  %p814_p11 = por %p813_p9, %p812_p8 }
  0x1d   : > { %p808_p5 = pneg %p807_p2 }
  0x1f   : > { %p815_p10 = pnand %p814_p11, %p808_p5 }
  0x21   : > { %818 = shalt.err (!%p815_p10)
}
  0x22   : > { %732 = dma.hbm_to_vmem [thread:$0]  (!%p920_p6), %s1019_s3, 2048, %s222_s29, [#allocation6], %s853_s6, %s853_s6, %s854_s7  }
  0x23   : > { %247 = sbr.rel (%p908_p3) target bundleno = 470 (0x1d6), region = 40 }
  0x28   : > { %832 = dma.done.wait (%p912_p4), [#allocation4], 2048  }
  0x29   : > { %834 = vsyncadd (%p912_p4), [#allocation4], 4294965248 }
  0x2a   : > { %836 = dma.done.wait (%p912_p4), [#allocation6], 2048  }
  0x2b   : > { %838 = vsyncadd (%p912_p4), [#allocation6], 4294965248  ;;  %v855_v0 = vmov 0.0   ;;  %vm856_vm0 = vmmov 0   ;;  %v308_v1 = vld [vmem:[#allocation3 + $0x78] sm:$0xff]  ;;  %v307_v2 = vld [vmem:[#allocation3 + $0x70] sm:$0xff] }
  0x2c   : > { %648 = vmatprep.subr.mxu0 %v855_v0  ;;  %680 = vmatprep.mubr.msk.f32.mxu0 %vm856_vm0, %v855_v0  ;;  %v306_v3 = vld [vmem:[#allocation3 + $0x68] sm:$0xff]  ;;  %v305_v4 = vld [vmem:[#allocation3 + $0x60] sm:$0xff]  ;;  %v402_v5 = vld [vmem:[#allocation5 + $0x78] sm:$0xff]  ;;  %p280_p3 = scmp.lt.s32.totalorder %s841_s18, 1 }
  0x2d   : > { %683 = vmatprep.subr.mxu1 %v855_v0  ;;  %715 = vmatprep.mubr.msk.f32.mxu1 %vm856_vm0, %v855_v0  ;;  %v304_v6 = vld [vmem:[#allocation3 + $0x58] sm:$0xff]  ;;  %v401_v7 = vld [vmem:[#allocation5 + $0x70] sm:$0xff]  ;;  %v400_v8 = vld [vmem:[#allocation5 + $0x68] sm:$0xff] }
  0x2e   : > { %649 = vmatpush3.msra.mxu0 %v308_v1  ;;  %684 = vmatpush3.msra.mxu1 %v402_v5  ;;  %v303_v9 = vld [vmem:[#allocation3 + $0x50] sm:$0xff]  ;;  %v399_v10 = vld [vmem:[#allocation5 + $0x60] sm:$0xff]  ;;  %v302_v11 = vld [vmem:[#allocation3 + $0x48] sm:$0xff]  ;;  %s1030_s18 = smov (!%p280_p3, %s841_s18), 1 }
  0x2f   : > { %650 = vmatprep.subr.mxu0 %v855_v0  ;;  %685 = vmatprep.subr.mxu1 %v855_v0  ;;  %v398_v12 = vld [vmem:[#allocation5 + $0x58] sm:$0xff]  ;;  %v301_v13 = vld [vmem:[#allocation3 + $0x40] sm:$0xff]  ;;  %v397_v14 = vld [vmem:[#allocation5 + $0x50] sm:$0xff]  ;;  %s608_s13 = sshll.u32 %s1030_s18, 3 }
  0x30   : > { %651 = vmatpush3.msra.mxu0 %v307_v2  ;;  %686 = vmatpush3.msra.mxu1 %v401_v7  ;;  %v300_v15 = vld [vmem:[#allocation3 + $0x38] sm:$0xff]  ;;  %v396_v16 = vld [vmem:[#allocation5 + $0x48] sm:$0xff]  ;;  %v299_v17 = vld [vmem:[#allocation3 + $0x30] sm:$0xff]  ;;  %s283_s16 = scalar_lea.vmem %s1016_s0, %s608_s13  ;;  %s291_s27 = scalar_lea.vmem %s1021_s5, %s608_s13 }
  0x31   : > { %652 = vmatprep.subr.mxu0 %v855_v0  ;;  %687 = vmatprep.subr.mxu1 %v855_v0  ;;  %v395_v18 = vld [vmem:[#allocation5 + $0x40] sm:$0xff]  ;;  %v298_v19 = vld [vmem:[#allocation3 + $0x28] sm:$0xff]  ;;  %v394_v20 = vld [vmem:[#allocation5 + $0x38] sm:$0xff] }
  0x32   : > { %653 = vmatpush3.msra.mxu0 %v306_v3  ;;  %688 = vmatpush3.msra.mxu1 %v400_v8  ;;  %v297_v21 = vld [vmem:[#allocation3 + $0x20] sm:$0xff]  ;;  %v393_v22 = vld [vmem:[#allocation5 + $0x30] sm:$0xff]  ;;  %v296_v23 = vld [vmem:[#allocation3 + $0x18] sm:$0xff] }
  0x33   : > { %654 = vmatprep.subr.mxu0 %v855_v0  ;;  %689 = vmatprep.subr.mxu1 %v855_v0  ;;  %v392_v24 = vld [vmem:[#allocation5 + $0x28] sm:$0xff]  ;;  %v295_v25 = vld [vmem:[#allocation3 + $0x10] sm:$0xff]  ;;  %v391_v26 = vld [vmem:[#allocation5 + $0x20] sm:$0xff] }
  0x34   : > { %655 = vmatpush3.msra.mxu0 %v305_v4  ;;  %690 = vmatpush3.msra.mxu1 %v399_v10  ;;  %v294_v27 = vld [vmem:[#allocation3 + $0x8] sm:$0xff]  ;;  %v390_v28 = vld [vmem:[#allocation5 + $0x18] sm:$0xff]  ;;  %v293_v29 = vld [vmem:[#allocation3] sm:$0xff] }
  0x35   : > { %656 = vmatprep.subr.mxu0 %v855_v0  ;;  %691 = vmatprep.subr.mxu1 %v855_v0  ;;  %v292_v30 = vld [vmem:[%s283_s16] sm:$0xff]  ;;  %v389_v31 = vld [vmem:[#allocation5 + $0x10] sm:$0xff]  ;;  %v388_v32 = vld [vmem:[#allocation5 + $0x8] sm:$0xff] }
  0x36   : > { %657 = vmatpush3.msra.mxu0 %v304_v6  ;;  %692 = vmatpush3.msra.mxu1 %v398_v12  ;;  %v387_v33 = vld [vmem:[#allocation5] sm:$0xff] }
  0x37   : > { %658 = vmatprep.subr.mxu0 %v855_v0  ;;  %693 = vmatprep.subr.mxu1 %v855_v0  ;;  %v610_v34 = vld [vmem:[%s1018_s2] ss:$0 sm:$0xff] }
  0x38   : > { %659 = vmatpush3.msra.mxu0 %v303_v9  ;;  %694 = vmatpush3.msra.mxu1 %v397_v14  ;;  %v611_v39 = vld [vmem:[%s1020_s4] ss:$0 sm:$0xff] }
  0x39   : > { %660 = vmatprep.subr.mxu0 %v855_v0  ;;  %695 = vmatprep.subr.mxu1 %v855_v0 }
  0x3a   : > { %661 = vmatpush3.msra.mxu0 %v302_v11  ;;  %696 = vmatpush3.msra.mxu1 %v396_v16 }
  0x3b   : > { %662 = vmatprep.subr.mxu0 %v855_v0  ;;  %697 = vmatprep.subr.mxu1 %v855_v0 }
  0x3c   : > { %663 = vmatpush3.msra.mxu0 %v301_v13  ;;  %698 = vmatpush3.msra.mxu1 %v395_v18 }
  0x3d   : > { %664 = vmatprep.subr.mxu0 %v855_v0  ;;  %699 = vmatprep.subr.mxu1 %v855_v0 }
  0x3e   : > { %665 = vmatpush3.msra.mxu0 %v300_v15  ;;  %700 = vmatpush3.msra.mxu1 %v394_v20 }
  0x3f   : > { %666 = vmatprep.subr.mxu0 %v855_v0  ;;  %701 = vmatprep.subr.mxu1 %v855_v0 }
  0x40   : > { %667 = vmatpush3.msra.mxu0 %v299_v17  ;;  %702 = vmatpush3.msra.mxu1 %v393_v22 }
  0x41   : > { %668 = vmatprep.subr.mxu0 %v855_v0  ;;  %703 = vmatprep.subr.mxu1 %v855_v0 }
  0x42   : > { %669 = vmatpush3.msra.mxu0 %v298_v19  ;;  %704 = vmatpush3.msra.mxu1 %v392_v24 }
  0x43   : > { %670 = vmatprep.subr.mxu0 %v855_v0  ;;  %705 = vmatprep.subr.mxu1 %v855_v0 }
  0x44   : > { %671 = vmatpush3.msra.mxu0 %v297_v21  ;;  %706 = vmatpush3.msra.mxu1 %v391_v26 }
  0x45   : > { %672 = vmatprep.subr.mxu0 %v855_v0  ;;  %707 = vmatprep.subr.mxu1 %v855_v0 }
  0x46   : > { %673 = vmatpush3.msra.mxu0 %v296_v23  ;;  %708 = vmatpush3.msra.mxu1 %v390_v28 }
  0x47   : > { %674 = vmatprep.subr.mxu0 %v855_v0  ;;  %709 = vmatprep.subr.mxu1 %v855_v0 }
  0x48   : > { %675 = vmatpush3.msra.mxu0 %v295_v25  ;;  %710 = vmatpush3.msra.mxu1 %v389_v31 }
  0x49   : > { %676 = vmatprep.subr.mxu0 %v855_v0  ;;  %711 = vmatprep.subr.mxu1 %v855_v0 }
  0x4a   : > { %677 = vmatpush3.msra.mxu0 %v294_v27  ;;  %712 = vmatpush3.msra.mxu1 %v388_v32 }
  0x4b   : > { %678 = vmatprep.subr.mxu0 %v855_v0  ;;  %713 = vmatprep.subr.mxu1 %v855_v0 }
  0x4c   : > { %679 = vmatpush3.msra.mxu0 %v293_v29  ;;  %714 = vmatpush3.msra.mxu1 %v387_v33 }
  0x4d   : > { %681 = vmatmul.mubr.f32.vlgmr.msra.gmra.mxu0 %v292_v30 }
 0x10d   : > { %v382_v35 = vpop.f32.mrf.mxu0 }
 0x10e   : > { %v383_v36 = vadd.f32 %v610_v34, %v382_v35 }
 0x10f   : > { %v682_v37 = vpop.f32.mrf.mxu0 }
 0x110   : > { %v386_v38 = vmax.f32 %v383_v36, 0.0 }
 0x112   : > { %716 = vmatmul.mubr.f32.vlgmr.msra.gmra.mxu1 %v386_v38 }
 0x1d2   : > { %v469_v40 = vpop.f32.mrf.mxu1 }
 0x1d3   : > { %v496_v41 = vadd.f32 %v611_v39, %v469_v40 }
 0x1d4   : > { %v717_v42 = vpop.f32.mrf.mxu1 }
 0x1d5   : > { %497 = vst [vmem:[%s291_s27] sm:$0xff] %v496_v41 }
 0x1d6 PF: > { %s17_s20 = sadd.s32 1, %s849_s20   ;;  %s1025_s18 = smov %s845_s19 }
 0x1d7   : > { %p14_p4 = scmp.ge.s32.totalorder %s17_s20, 4   ;;  %s1026_s19 = smov %s1028_s22 }
 0x1d9   :  { %16 = sbr.rel (!%p14_p4) target bundleno = 3 (0x3), region = 96 }
 0x1de   :  { %517 = vsyncpa [#allocation4], 1 }
 0x1df   :  { %519 = vsyncpa [#allocation4 + $0x1], 1 }
 0x1e0   :  { %520 = vsyncpa [#allocation6], 1 }

</bundles_post_ra>
